<compile_context>
chip_gen: v6e
topology: v6e:2x2x1
jax: 0.10.0
libtpu: 0.0.40
codegen_flags: <defaults>
</compile_context>

<pallas_src>
import functools

import jax
import jax.numpy as jnp
from jax.experimental import pallas as pl
from jax.experimental.pallas import tpu as pltpu


def _group3_reduce_broadcast(v, combine_center):
    """Per-lane reduction over consecutive groups of 3 lanes, broadcast back.

    `v` is (rows, C) with C % 3 == 0 and every point's 3 components occupying
    lanes (3g, 3g+1, 3g+2) of one row.  Returns an array of the same shape
    where every lane holds the reduction of its own group.

    Implementation: roll by +1 and by C-1 gives the two lane neighbors (in
    some order -- we never rely on which is which).  `combine_center` of
    (self, nbr_a, nbr_b) is the correct group reduction at the *center* lane
    (3g+1) of each group.  Masking everything but the centers to zero and
    summing the value with both of its rolled neighbors then broadcasts each
    group's reduction to all three of its lanes, independent of roll
    direction, and the circular wrap at lane 0 / C-1 only ever picks up
    masked zeros.  All values involved are >= 0, so the zero fill is safe for
    both the sum (L2) and max (L_inf) reductions.
    """
    c = v.shape[-1]
    nbr_a = pltpu.roll(v, shift=1, axis=1)
    nbr_b = pltpu.roll(v, shift=c - 1, axis=1)
    center_val = combine_center(v, nbr_a, nbr_b)

    lane = jax.lax.broadcasted_iota(jnp.int32, v.shape, dimension=1)
    is_center = (lane % 3) == 1
    tc = jnp.where(is_center, center_val, 0.0)
    return tc + pltpu.roll(tc, shift=1, axis=1) + pltpu.roll(tc, shift=c - 1, axis=1)


def _contract_kernel(x_ref, o_ref, *, use_inf_norm: bool):
    """Lane-dense elementwise hot path: per-point norm + contraction + select."""
    xf = x_ref[...].astype(jnp.float32)

    if use_inf_norm:
        absx = jnp.abs(xf)
        mag = _group3_reduce_broadcast(
            absx, lambda a, b, c: jnp.maximum(jnp.maximum(a, b), c))
        inside = mag < 1.0
        inv = 1.0 / jnp.maximum(mag, 1e-30)          # clamp: no inf/NaN at origin
    else:
        sq = xf * xf
        mag2 = _group3_reduce_broadcast(sq, lambda a, b, c: a + b + c)
        inside = mag2 < 1.0                          # mag < 1  <=>  mag^2 < 1
        inv = jax.lax.rsqrt(jnp.maximum(mag2, 1e-30))  # EUP rsqrt, no sqrt+div

    contracted = (2.0 - inv) * (xf * inv)
    o_ref[...] = jnp.where(inside, xf, contracted).astype(o_ref.dtype)


def scene_contraction(positions, order=None, *, lanes: int = 384, block_rows: int = 1024):
    """Pallas implementation of SceneContraction.forward for Tensor inputs.

    Args:
      positions: float array of shape (*bs, 3).
      order: None or 2 (L2 / Frobenius norm) or float('inf') (L_inf norm).
      lanes: lane width of the flattened slab; must be a multiple of 384.
      block_rows: rows per grid block; must be a multiple of 8.
    Returns:
      Array of the same shape/dtype with contracted coordinates.
    """
    if order is None or order == 2:
        use_inf_norm = False
    elif order == float("inf"):
        use_inf_norm = True
    else:
        raise NotImplementedError(
            "SceneContraction Pallas kernel supports only order in "
            "{None, 2, float('inf')}")
    if lanes % 384 != 0:
        raise ValueError("lanes must be a multiple of 384 (= lcm(3, 128))")
    if block_rows % 8 != 0:
        raise ValueError("block_rows must be a multiple of 8")

    orig_shape = positions.shape
    if orig_shape[-1] != 3:
        raise ValueError("positions must have last dimension 3")

    total = positions.size
    flat = positions.reshape(total)          # free (layout-compatible) reshape
    pad = (-total) % lanes
    if pad:
        # Tail-only pad; costs one extra HBM pass but is skipped whenever the
        # point count is a multiple of 128 (the common case for ray batches).
        flat = jnp.pad(flat, (0, pad))
    padded = total + pad
    rows = padded // lanes
    x2d = flat.reshape(rows, lanes)          # free reshape

    br = block_rows if rows >= block_rows else rows   # full-dim block if small
    grid = (pl.cdiv(rows, br),)                       # non-divisible tail OK

    kernel = functools.partial(_contract_kernel, use_inf_norm=use_inf_norm)
    out2d = pl.pallas_call(
        kernel,
        out_shape=jax.ShapeDtypeStruct((rows, lanes), positions.dtype),
        grid=grid,
        in_specs=[pl.BlockSpec((br, lanes), lambda i: (i, 0))],
        out_specs=pl.BlockSpec((br, lanes), lambda i: (i, 0)),
        compiler_params=pltpu.CompilerParams(dimension_semantics=("parallel",)),
    )(x2d)

    out_flat = out2d.reshape(padded)
    if pad:
        out_flat = out_flat[:total]
    return out_flat.reshape(orig_shape)


def _reference(positions, order=None):
    """Plain-JAX reference mirroring the PyTorch forward."""
    if order == float("inf"):
        mag = jnp.max(jnp.abs(positions), axis=-1, keepdims=True)
    else:
        mag = jnp.linalg.norm(positions, axis=-1, keepdims=True)
    return jnp.where(mag < 1, positions, (2 - 1 / mag) * (positions / mag))


if __name__ == "__main__":
    key = jax.random.PRNGKey(0)
    k1, k2, k3 = jax.random.split(key, 3)

    # (*bs, 3) unbounded scene coordinates; scale 3.0 exercises both branches.
    pos_small = 3.0 * jax.random.normal(k1, (2, 8, 16, 3), dtype=jnp.float32)
    # Point count not a multiple of 128 -> exercises the (rare) pad path.
    pos_odd = 3.0 * jax.random.normal(k2, (5, 7, 3), dtype=jnp.float32)
    # Multi-step grid with a partial final row-block (block_rows=64 -> 3 steps).
    pos_multi = 3.0 * jax.random.normal(k3, (19200, 3), dtype=jnp.float32)

    contract_l2 = jax.jit(functools.partial(scene_contraction, order=None))
    contract_linf = jax.jit(functools.partial(scene_contraction, order=float("inf")))

    # Default order (Frobenius / L2 norm) -> contracts to a sphere of radius 2.
    out = jax.block_until_ready(contract_l2(pos_small))
    ref = _reference(pos_small, order=None)
    assert out.shape == pos_small.shape and out.dtype == pos_small.dtype
    assert jnp.allclose(out, ref, atol=1e-5, rtol=1e-5)

    # L_inf variant -> contracts to a cube of side length 4.
    out_inf = jax.block_until_ready(contract_linf(pos_small))
    ref_inf = _reference(pos_small, order=float("inf"))
    assert jnp.allclose(out_inf, ref_inf, atol=1e-5, rtol=1e-5)

    # Pad path (flattened size not a multiple of 384).
    out_odd = jax.block_until_ready(contract_l2(pos_odd))
    assert jnp.allclose(out_odd, _reference(pos_odd, order=None),
                        atol=1e-5, rtol=1e-5)
    out_odd_inf = jax.block_until_ready(contract_linf(pos_odd))
    assert jnp.allclose(out_odd_inf, _reference(pos_odd, order=float("inf")),
                        atol=1e-5, rtol=1e-5)

    # Multi-block grid with a partial final block.
    out_multi = jax.block_until_ready(
        scene_contraction(pos_multi, order=None, block_rows=64))
    assert jnp.allclose(out_multi, _reference(pos_multi, order=None),
                        atol=1e-5, rtol=1e-5)
    out_multi_inf = jax.block_until_ready(
        scene_contraction(pos_multi, order=float("inf"), block_rows=64))
    assert jnp.allclose(out_multi_inf, _reference(pos_multi, order=float("inf")),
                        atol=1e-5, rtol=1e-5)

    print("KERNEL_OK")
</pallas_src>

<mosaic_0001>
module attributes {stable_mosaic.version = 11 : i64} {
  func.func @_contract_kernel(%arg0: i32, %arg1: memref<2x384xf32, #tpu.memory_space<vmem>>, %arg2: memref<2x384xf32, #tpu.memory_space<vmem>>) attributes {dimension_semantics = [#tpu.dimension_semantics<parallel>], iteration_bounds = array<i64: 1>, scalar_prefetch = 0 : i64, scratch_operands = 0 : i64, tpu.core_type = #tpu.core_type<tc>, window_params = [{transform_indices = @transform_0, window_bounds = array<i64: 2, 384>}, {transform_indices = @transform_1, window_bounds = array<i64: 2, 384>}]} {
    %c0 = arith.constant 0 : index
    %c0_0 = arith.constant 0 : index
    %0 = vector.load %arg1[%c0, %c0_0] : memref<2x384xf32, #tpu.memory_space<vmem>>, vector<2x384xf32>
    %1 = arith.mulf %0, %0 : vector<2x384xf32>
    %c1_i32 = arith.constant 1 : i32
    %2 = tpu.dynamic_rotate %1 by %c1_i32 dim 1 : vector<2x384xf32>, i32 -> vector<2x384xf32>
    %c383_i32 = arith.constant 383 : i32
    %3 = tpu.dynamic_rotate %1 by %c383_i32 dim 1 : vector<2x384xf32>, i32 -> vector<2x384xf32>
    %4 = arith.addf %1, %2 : vector<2x384xf32>
    %5 = arith.addf %4, %3 : vector<2x384xf32>
    %6 = tpu.iota {dimensions = array<i32: 1>} : vector<2x384xi32>
    %c3_i32 = arith.constant 3 : i32
    %c0_i32 = arith.constant 0 : i32
    %7 = arith.cmpi eq, %c3_i32, %c0_i32 : i32
    %c1_i32_1 = arith.constant 1 : i32
    %8 = arith.select %7, %c1_i32_1, %c3_i32 : i32
    %9 = vector.broadcast %8 : i32 to vector<2x384xi32>
    %10 = arith.remsi %6, %9 : vector<2x384xi32>
    %c0_i32_2 = arith.constant 0 : i32
    %11 = vector.broadcast %c0_i32_2 : i32 to vector<2x384xi32>
    %12 = arith.cmpi ne, %10, %11 : vector<2x384xi32>
    %c0_i32_3 = arith.constant 0 : i32
    %13 = vector.broadcast %c0_i32_3 : i32 to vector<2x384xi32>
    %14 = arith.cmpi slt, %10, %13 : vector<2x384xi32>
    %c0_i32_4 = arith.constant 0 : i32
    %15 = arith.cmpi slt, %8, %c0_i32_4 : i32
    %16 = vector.broadcast %15 : i1 to vector<2x384xi1>
    %17 = vector.broadcast %16 : vector<2x384xi1> to vector<2x384xi1>
    %18 = arith.xori %14, %17 : vector<2x384xi1>
    %19 = arith.andi %18, %12 : vector<2x384xi1>
    %20 = vector.broadcast %8 : i32 to vector<2x384xi32>
    %21 = arith.addi %10, %20 : vector<2x384xi32>
    %22 = arith.select %19, %21, %10 : vector<2x384xi1>, vector<2x384xi32>
    %c1_i32_5 = arith.constant 1 : i32
    %23 = vector.broadcast %c1_i32_5 : i32 to vector<2x384xi32>
    %24 = arith.cmpi eq, %22, %23 : vector<2x384xi32>
    %cst = arith.constant 0.000000e+00 : f32
    %25 = vector.broadcast %cst : f32 to vector<2x384xf32>
    %26 = arith.select %24, %5, %25 : vector<2x384xi1>, vector<2x384xf32>
    %c1_i32_6 = arith.constant 1 : i32
    %27 = tpu.dynamic_rotate %26 by %c1_i32_6 dim 1 : vector<2x384xf32>, i32 -> vector<2x384xf32>
    %28 = arith.addf %26, %27 : vector<2x384xf32>
    %c383_i32_7 = arith.constant 383 : i32
    %29 = tpu.dynamic_rotate %26 by %c383_i32_7 dim 1 : vector<2x384xf32>, i32 -> vector<2x384xf32>
    %30 = arith.addf %28, %29 : vector<2x384xf32>
    %cst_8 = arith.constant 1.000000e+00 : f32
    %31 = vector.broadcast %cst_8 : f32 to vector<2x384xf32>
    %32 = arith.cmpf olt, %30, %31 : vector<2x384xf32>
    %cst_9 = arith.constant 1.000000e-30 : f32
    %33 = vector.broadcast %cst_9 : f32 to vector<2x384xf32>
    %34 = arith.maximumf %30, %33 : vector<2x384xf32>
    %35 = math.rsqrt %34 : vector<2x384xf32>
    %cst_10 = arith.constant 2.000000e+00 : f32
    %36 = vector.broadcast %cst_10 : f32 to vector<2x384xf32>
    %37 = arith.subf %36, %35 : vector<2x384xf32>
    %38 = arith.mulf %0, %35 : vector<2x384xf32>
    %39 = arith.mulf %37, %38 : vector<2x384xf32>
    %40 = arith.select %32, %0, %39 : vector<2x384xi1>, vector<2x384xf32>
    %c0_11 = arith.constant 0 : index
    %c0_12 = arith.constant 0 : index
    %41 = vector.load %arg2[%c0_11, %c0_12] : memref<2x384xf32, #tpu.memory_space<vmem>>, vector<2x384xf32>
    tpu.vector_store %arg2[%c0_11, %c0_12], %40 {strides = array<i32>} : memref<2x384xf32, #tpu.memory_space<vmem>>, vector<2x384xf32>,
    return
  }
  func.func @transform_0(%arg0: i32) -> (i32, i32) {
    %c0_i32 = arith.constant 0 : i32
    %c0_i32_0 = arith.constant 0 : i32
    return %arg0, %c0_i32 : i32, i32
  }
  func.func @transform_1(%arg0: i32) -> (i32, i32) {
    %c0_i32 = arith.constant 0 : i32
    %c0_i32_0 = arith.constant 0 : i32
    return %arg0, %c0_i32 : i32, i32
  }
}

</mosaic_0001>

<bundles_post_ra>
// kernel: scene_contraction.1
= control target key start
LH: loop header
LB: loop body
LE: loop exit
PB: predicated region body
PF: predicated region fallthrough
CT: control target
= control target key end

     0   :  { %v15_v0 = vlaneseq  ;;  %v314_v2 = vmov 1983009808   ;;  %s316_s8 = smov 127   ;;  %s421_s0 = inlined_call_operand.vmem [shape: f32[2,384], index: 0, kind: input, shape index: {}]   ;;  %s422_s1 = inlined_call_operand.vmem [shape: f32[2,384], index: 1, kind: output, shape index: {}]  }
   0x1   :  { %v330_v1 = vld [vmem:[%s421_s0] sm:$0x3f]  ;;  %v13_v3 = vunpack.c.l.s4 %v314_v2  ;;  %s315_s0 = smov 1  }
   0x2   :  { %v334_v4 = vmul.f32 %v330_v1, %v330_v1  ;;  %v16_v5 = vshrl.u32 %v15_v0, 7  ;;  %v349_v12 = vand.u32 127, %v15_v0 }
   0x3   :  { %v14_v6 = vunpack.c.0.s8 %v13_v3 }
   0x4   :  { %v11_v7 = vcombine.high %v334_v4, %v334_v4  ;;  %v352_v13 = vmul.u32.u64.low 2863311531, %v349_v12  ;;  %v353_v14 = vmul.u32.u64.high 2863311531, %v349_v12, %v352_v13  ;;  %v94_v15 = vadd.s32 128, %v349_v12 }
   0x5   :  { %v338_v8 = vsub.s32 %v14_v6, %v16_v5  ;;  %v95_v16 = vadd.s32 256, %v349_v12  ;;  %vm38_vm0 = vcmp.lt.s32.totalorder %v349_v12, 1  ;;  %vm48_vm1 = vcmp.lt.s32.totalorder %v349_v12, 127 }
   0x6   :  { %v357_v17 = vmul.u32.u64.low 2863311531, %v94_v15  ;;  %v358_v18 = vmul.u32.u64.high 2863311531, %v94_v15, %v357_v17  ;;  %v102_v21 = vshrl.u32 %v353_v14, 1 }
   0x7   :  { %v18_v9 = vrot.slane %v334_v4, %v338_v8  ;;  %v25_v10 = vrot.slane %v11_v7, %v338_v8  ;;  %v360_v19 = vmul.u32.u64.low 2863311531, %v95_v16  ;;  %v361_v20 = vmul.u32.u64.high 2863311531, %v95_v16, %v360_v19 }
   0x8   :  { %v103_v22 = vmul.u32 3, %v102_v21  ;;  %v113_v23 = vshrl.u32 %v358_v18, 1 }
   0x9   :  { %30 = vrot.lane.b32.xlu0 %v18_v9, %s315_s0  ;;  %34 = vrot.lane.b32.xlu1 %v25_v10, %s315_s0  ;;  %v26_v11 = vcombine.high %v18_v9, %v18_v9  ;;  %v124_v26 = vshrl.u32 %v361_v20, 1 }
   0xa   :  { %v104_v27 = vsub.s32 %v349_v12, %v103_v22  ;;  %v114_v28 = vmul.u32 3, %v113_v23  ;;  %v251_v12 = vcombine.high %v330_v1, %v330_v1 }
   0xb   :  { %v125_v31 = vmul.u32 3, %v124_v26 }
   0xc   :  { %vm129_vm2 = vcmp.ne.s32.totalorder %v104_v27, 0  ;;  %v115_v36 = vsub.s32 %v94_v15, %v114_v28  ;;  %vm132_vm3 = vcmp.lt.s32.totalorder %v104_v27, 0  ;;  %v138_v47 = vadd.s32 3, %v104_v27 }
   0xd   :  { %32 = vrot.lane.b32.xlu0 %v26_v11, %s315_s0  ;;  %42 = vrot.lane.b32.xlu1 %v18_v9, %s316_s8  ;;  %v126_v41 = vsub.s32 %v95_v16, %v125_v31  ;;  %vm135_vm4 = vmand %vm132_vm3, %vm129_vm2 }
   0xe   :  { %vm130_vm5 = vcmp.ne.s32.totalorder %v115_v36, 0  ;;  %vm133_vm6 = vcmp.lt.s32.totalorder %v115_v36, 0  ;;  %v139_v50 = vadd.s32 3, %v115_v36  ;;  %v141_v53 = vsel %vm135_vm4, %v138_v47, %v104_v27 }
   0xf   :  { %vm131_vm7 = vcmp.ne.s32.totalorder %v126_v41, 0  ;;  %vm134_vm8 = vcmp.lt.s32.totalorder %v126_v41, 0  ;;  %vm136_vm9 = vmand %vm133_vm6, %vm130_vm5  ;;  %v140_v54 = vadd.s32 3, %v126_v41  ;;  %vm144_vm11 = vcmp.eq.s32.totalorder %v141_v53, 1 }
  0x10   :  { %vm137_vm10 = vmand %vm134_vm8, %vm131_vm7  ;;  %v142_v57 = vsel %vm136_vm9, %v139_v50, %v115_v36 }
  0x11   :  { %44 = vrot.lane.b32.xlu0 %v26_v11, %s316_s8  ;;  %46 = vrot.lane.b32.xlu1 %v25_v10, %s316_s8  ;;  %v143_v58 = vsel %vm137_vm10, %v140_v54, %v126_v41  ;;  %vm145_vm12 = vcmp.eq.s32.totalorder %v142_v57, 1 }
  0x12   :  { %vm146_vm13 = vcmp.eq.s32.totalorder %v143_v58, 1 }
  0x7b   :  { %v31_v24 = vpop.permute.xlu0 %30  ;;  %v35_v25 = vpop.permute.xlu1 %34 }
  0x7c   :  { %v41_v32 = vsel %vm38_vm0, %v35_v25, %v31_v24 }
  0x7f   :  { %v33_v29 = vpop.permute.xlu0 %32  ;;  %v43_v30 = vpop.permute.xlu1 %42 }
  0x80   :  { %v39_v33 = vsel %vm38_vm0, %v33_v29, %v35_v25  ;;  %v40_v34 = vsel %vm38_vm0, %v31_v24, %v33_v29 }
  0x81   :  { %v55_v35 = vcombine.low %v41_v32, %v40_v34  ;;  %v69_v38 = vrot.slane %v39_v33, %v338_v8  ;;  %v258_v32 = vrot.slane %v330_v1, %v338_v8 }
  0x83   :  { %v62_v37 = vrot.slane %v55_v35, %v338_v8  ;;  %v45_v39 = vpop.permute.xlu0 %44  ;;  %v47_v40 = vpop.permute.xlu1 %46 }
  0x84   :  { %v50_v42 = vsel %vm48_vm1, %v43_v30, %v45_v39  ;;  %v49_v43 = vsel %vm48_vm1, %v45_v39, %v47_v40  ;;  %v51_v44 = vsel %vm48_vm1, %v47_v40, %v43_v30  ;;  %v266_v39 = vcombine.high %v258_v32, %v258_v32 }
  0x85   :  { %v70_v45 = vcombine.low %v62_v37, %v69_v38  ;;  %v76_v46 = vcombine.low %v50_v42, %v49_v43  ;;  %v90_v49 = vrot.slane %v51_v44, %v338_v8  ;;  %v265_v37 = vrot.slane %v251_v12, %v338_v8 }
  0x87   :  { %v83_v48 = vrot.slane %v76_v46, %v338_v8  ;;  %v72_v51 = vadd.f32 %v70_v45, %v334_v4 }
  0x89   :  { %v91_v52 = vcombine.low %v83_v48, %v90_v49 }
  0x8b   :  { %v93_v55 = vadd.f32 %v91_v52, %v72_v51 }
  0x8d   :  { %v155_v56 = vrot.slane %v93_v55, %v338_v8  ;;  %v148_v59 = vcombine.high %v93_v55, %v93_v55 }
  0x8f   :  { %v167_v60 = vsel %vm144_vm11, %v155_v56, 0.0  ;;  %v163_v61 = vcombine.high %v155_v56, %v155_v56  ;;  %v162_v62 = vrot.slane %v148_v59, %v338_v8 }
  0x90   :  { %182 = vrot.lane.b32.xlu1 %v167_v60, %s316_s8  ;;  %170 = vrot.lane.b32.xlu0 %v167_v60, %s315_s0 }
  0x91   :  { %v168_v63 = vsel %vm145_vm12, %v163_v61, 0.0  ;;  %v169_v0 = vsel %vm146_vm13, %v162_v62, 0.0 }
  0x94   :  { %172 = vrot.lane.b32.xlu1 %v168_v63, %s315_s0  ;;  %174 = vrot.lane.b32.xlu0 %v169_v0, %s315_s0 }
  0x98   :  { %186 = vrot.lane.b32.xlu1 %v169_v0, %s316_s8  ;;  %184 = vrot.lane.b32.xlu0 %v168_v63, %s316_s8 }
 0x102   :  { %v183_v2 = vpop.permute.xlu1 %182  ;;  %v171_v3 = vpop.permute.xlu0 %170 }
 0x106   :  { %v173_v4 = vpop.permute.xlu1 %172  ;;  %v175_v5 = vpop.permute.xlu0 %174 }
 0x107   :  { %v177_v6 = vsel %vm38_vm0, %v171_v3, %v173_v4  ;;  %v176_v7 = vsel %vm38_vm0, %v173_v4, %v175_v5  ;;  %v178_v9 = vsel %vm38_vm0, %v175_v5, %v171_v3 }
 0x108   :  { %v180_v10 = vadd.f32 %v177_v6, %v168_v63  ;;  %v179_v11 = vadd.f32 %v178_v9, %v167_v60  ;;  %v181_v13 = vadd.f32 %v176_v7, %v169_v0 }
 0x10a   :  { %v187_v14 = vpop.permute.xlu1 %186  ;;  %v185_v15 = vpop.permute.xlu0 %184 }
 0x10b   :  { %v190_v16 = vsel %vm48_vm1, %v187_v14, %v183_v2  ;;  %v188_v17 = vsel %vm48_vm1, %v185_v15, %v187_v14  ;;  %v189_v18 = vsel %vm48_vm1, %v183_v2, %v185_v15 }
 0x10c   :  { %v193_v19 = vadd.f32 %v190_v16, %v181_v13  ;;  %v191_v20 = vadd.f32 %v189_v18, %v179_v11  ;;  %v192_v21 = vadd.f32 %v188_v17, %v180_v10 }
 0x10e   :  { %v199_v22 = vmax.f32 %v193_v19, 1e-30  ;;  %v197_v23 = vmax.f32 %v191_v20, 1e-30  ;;  %v198_v24 = vmax.f32 %v192_v21, 1e-30 }
 0x10f   :  { %vm196_vm14 = vcmp.lt.f32.partialorder %v193_v19, 1.0  ;;  %vm194_vm15 = vcmp.lt.f32.partialorder %v191_v20, 1.0  ;;  %vm195_vm0 = vcmp.lt.f32.partialorder %v192_v21, 1.0 }
 0x110   :  { %308 = vrsqrt.f32 %v199_v22 }
 0x111   :  { %310 = vrsqrt.f32 %v197_v23 }
 0x112   :  { %312 = vrsqrt.f32 %v198_v24 }
 0x11d   :  { %v309_v25 = vpop.eup %308 }
 0x11e   :  { %v311_v26 = vpop.eup %310  ;;  %v223_v29 = vrot.slane %v309_v25, %v338_v8  ;;  %v205_v38 = vsub.f32 2.0, %v309_v25 }
 0x11f   :  { %v313_v27 = vpop.eup %312  ;;  %v203_v34 = vsub.f32 2.0, %v311_v26 }
 0x120   :  { %v209_v28 = vcombine.low %v311_v26, %v313_v27  ;;  %v204_v40 = vsub.f32 2.0, %v313_v27 }
 0x122   :  { %v216_v30 = vrot.slane %v209_v28, %v338_v8 }
 0x124   :  { %v224_v31 = vcombine.low %v216_v30, %v223_v29 }
 0x126   :  { %v226_v33 = vmul.f32 %v224_v31, %v330_v1 }
 0x128   :  { %v228_v35 = vcombine.high %v226_v33, %v226_v33  ;;  %v235_v36 = vrot.slane %v226_v33, %v338_v8 }
 0x12a   :  { %v242_v41 = vrot.slane %v228_v35, %v338_v8  ;;  %v243_v42 = vcombine.high %v235_v36, %v235_v36  ;;  %v247_v43 = vmul.f32 %v235_v36, %v203_v34 }
 0x12c   :  { %v248_v44 = vmul.f32 %v243_v42, %v204_v40  ;;  %v249_v45 = vmul.f32 %v242_v41, %v205_v38  ;;  %v270_v46 = vsel %vm194_vm15, %v258_v32, %v247_v43 }
 0x12e   :  { %v271_v1 = vsel %vm195_vm0, %v266_v39, %v248_v44  ;;  %v272_v47 = vsel %vm196_vm14, %v265_v37, %v249_v45 }
 0x12f   :  { %v276_v48 = vcombine.low %v270_v46, %v271_v1  ;;  %v290_v50 = vrot.slane %v272_v47, %v338_v8 }
 0x131   :  { %v283_v49 = vrot.slane %v276_v48, %v338_v8 }
 0x133   :  { %v291_v51 = vcombine.low %v283_v49, %v290_v50 }
 0x135   :  { %293 = vst [vmem:[%s422_s1] sm:$0x3f] %v291_v51 }

</bundles_post_ra>
